<compile_context>
chip_gen: v7x
topology: tpu7x:2x2x1
jax: 0.10.0
libtpu: 0.0.40
codegen_flags: <defaults>
</compile_context>

<pallas_src>
import functools

import jax
import jax.numpy as jnp
from jax.experimental import pallas as pl
from jax.experimental.pallas import tpu as pltpu


def _round_up(x, m):
    return -(-x // m) * m


def _vmem_budget_bytes():
    """Scoped-VMEM limit for this kernel (half of physical, capped at 64 MiB)."""
    try:
        cap = pltpu.get_tpu_info().vmem_capacity_bytes
    except Exception:
        cap = 64 * 1024 * 1024  # conservative (v7x per-TensorCore VMEM)
    return int(min(cap // 2, 64 * 1024 * 1024))


def _choose_tm(M, Kp, E, vmem_limit):
    """Largest MXU-friendly row tile that fits the VMEM budget.

    Budget model: double-buffered bf16 LHS (tm, Kp) + double-buffered f32
    output (tm, E), plus bf16 weight (Kp, E) and bias (double-buffered,
    conservative).
    """
    budget = int(vmem_limit * 0.75)
    fixed = 2 * (Kp * E * 2) + 2 * (8 * E * 4)      # weight + bias buffers
    per_row = 2 * (Kp * 2) + 2 * (E * 4)            # LHS bf16 x2 + out f32 x2
    cap = max(8, (budget - fixed) // per_row)

    cands = [c for c in (1024, 768, 512, 256, 128, 64, 32, 16, 8) if c <= cap]
    tm = cands[0]
    # Prefer the biggest tile, but avoid gross zero-padding waste on small/odd M.
    for c in cands:
        if _round_up(M, c) - M <= max(M // 8, 0):
            tm = c
            break
    return min(tm, _round_up(M, 8))


def _patch_embed_kernel(x_ref, w_ref, b_ref, o_ref):
    # x_ref: (tm, Kp) bf16, w_ref: (Kp, E) bf16, b_ref: (1, E) f32, o_ref: (tm, E) f32
    acc = jnp.dot(x_ref[...], w_ref[...], preferred_element_type=jnp.float32)
    o_ref[...] = (acc + b_ref[...]).astype(o_ref.dtype)


def _patch_matmul(patches, weight, bias, *, tm, vmem_limit):
    Mp, Kp = patches.shape
    _, E = weight.shape
    bias2d = bias.reshape(1, E).astype(jnp.float32)

    cost = pl.CostEstimate(
        flops=2 * Mp * Kp * E,
        bytes_accessed=int(Mp * Kp * 2 + Kp * E * 2 + E * 4 + Mp * E * 4),
        transcendentals=0,
    )

    return pl.pallas_call(
        _patch_embed_kernel,
        out_shape=jax.ShapeDtypeStruct((Mp, E), jnp.float32),
        grid_spec=pltpu.PrefetchScalarGridSpec(
            num_scalar_prefetch=0,
            grid=(Mp // tm,),
            in_specs=[
                pl.BlockSpec((tm, Kp), lambda i: (i, 0)),
                # Grid-invariant operands: same block index every step, so the DMA
                # happens once and the VMEM copy is reused across iterations.
                pl.BlockSpec((Kp, E), lambda i: (0, 0)),
                pl.BlockSpec((1, E), lambda i: (0, 0)),
            ],
            out_specs=pl.BlockSpec((tm, E), lambda i: (i, 0)),
        ),
        compiler_params=pltpu.CompilerParams(
            dimension_semantics=("parallel",),
            vmem_limit_bytes=vmem_limit,
        ),
        cost_estimate=cost,
    )(patches, weight, bias2d)


def patch_embed_forward(x, conv_w, conv_b, patch_size):
    """x: (N, C, T, H, W) float32. conv_w: (E, C, 1, ph, pw). conv_b: (E,).

    Returns (N*T, (H/ph)*(W/pw), E) float32, matching the PyTorch module.
    """
    pt, ph, pw = patch_size
    assert pt == 1, "STAM PatchEmbed uses temporal patch size 1"
    N, C, T, H, W = x.shape
    assert H % ph == 0 and W % pw == 0
    E = conv_w.shape[0]
    Hp, Wp = H // ph, W // pw

    K = C * ph * pw
    Kp = _round_up(K, 128)
    M = N * T * Hp * Wp

    # --- patch extraction (fused by XLA into one copy; bf16 halves HBM traffic) ---
    # (N, C, T, Hp, ph, Wp, pw) -> (N, T, Hp, Wp, C, ph, pw) -> (M, K)
    xp = x.astype(jnp.bfloat16).reshape(N, C, T, Hp, ph, Wp, pw)
    xp = jnp.transpose(xp, (0, 2, 3, 5, 1, 4, 6))
    patches = xp.reshape(M, K)

    # Weight (E, C, 1, ph, pw) -> (K, E), flattened in the same (C, ph, pw) order.
    w2d = conv_w.reshape(E, K).T.astype(jnp.bfloat16)

    # Lane-align the contraction dim (no-op when K is already a multiple of 128).
    if Kp != K:
        patches = jnp.pad(patches, ((0, 0), (0, Kp - K)))
        w2d = jnp.pad(w2d, ((0, Kp - K), (0, 0)))

    vmem_limit = _vmem_budget_bytes()
    tm = _choose_tm(M, Kp, E, vmem_limit)
    Mp = _round_up(M, tm)
    if Mp != M:
        patches = jnp.pad(patches, ((0, Mp - M), (0, 0)))  # pad rows, sliced off below

    out = _patch_matmul(patches, w2d, conv_b, tm=tm, vmem_limit=vmem_limit)  # (Mp, E)
    out = out[:M]
    # TODO(synk): if downstream layers accept bf16, emit a bf16 output to also halve
    # the kernel's HBM write traffic.
    return out.reshape(N * T, Hp * Wp, E)


if __name__ == "__main__":
    # Small, module-consistent shapes:
    #   clip_len=4, img_size=32, patch_size=(1,16,16), in_chans=3, embed_dim=128
    N, C, T, H, W = 2, 3, 4, 32, 32
    patch_size = (1, 16, 16)
    E = 128

    key = jax.random.PRNGKey(0)
    kx, kw, kb = jax.random.split(key, 3)
    x = jax.random.normal(kx, (N, C, T, H, W), dtype=jnp.float32)
    conv_w = jax.random.normal(kw, (E, C, *patch_size), dtype=jnp.float32) * 0.02
    conv_b = jax.random.normal(kb, (E,), dtype=jnp.float32) * 0.02

    fwd = jax.jit(functools.partial(patch_embed_forward, patch_size=patch_size))
    out = jax.block_until_ready(fwd(x, conv_w, conv_b))

    # sanity: shape matches torch's (N*T, Hp*Wp, E)
    Hp, Wp = H // patch_size[1], W // patch_size[2]
    assert out.shape == (N * T, Hp * Wp, E), out.shape

    # reference: conv-as-matmul with the same bf16 input quantization, f32 accumulation
    xp = x.reshape(N, C, T, Hp, patch_size[1], Wp, patch_size[2])
    xp = jnp.transpose(xp, (0, 2, 3, 5, 1, 4, 6)).reshape(N * T * Hp * Wp, -1)
    ref = jnp.dot(
        xp.astype(jnp.bfloat16),
        conv_w.reshape(E, -1).T.astype(jnp.bfloat16),
        preferred_element_type=jnp.float32,
    ) + conv_b
    ref = ref.reshape(N * T, Hp * Wp, E)
    assert jnp.allclose(out, ref, atol=1e-2, rtol=1e-2), float(
        jnp.max(jnp.abs(out - ref))
    )

    print("KERNEL_OK")
</pallas_src>

<mosaic_0001>
module attributes {stable_mosaic.version = 11 : i64} {
  func.func @_patch_embed_kernel(%arg0: i32, %arg1: memref<32x768xbf16, #tpu.memory_space<vmem>>, %arg2: memref<768x128xbf16, #tpu.memory_space<vmem>>, %arg3: memref<1x128xf32, #tpu.memory_space<vmem>>, %arg4: memref<32x128xf32, #tpu.memory_space<vmem>>) attributes {dimension_semantics = [#tpu.dimension_semantics<parallel>], iteration_bounds = array<i64: 1>, scalar_prefetch = 0 : i64, scratch_operands = 0 : i64, tpu.core_type = #tpu.core_type<tc>, window_params = [{transform_indices = @transform_0, window_bounds = array<i64: 32, 768>}, {pipeline_mode = #tpu.pipeline_mode<synchronous>, transform_indices = @transform_1, window_bounds = array<i64: 768, 128>}, {pipeline_mode = #tpu.pipeline_mode<synchronous>, transform_indices = @transform_2, window_bounds = array<i64: 1, 128>}, {transform_indices = @transform_3, window_bounds = array<i64: 32, 128>}]} {
    %c0 = arith.constant 0 : index
    %c0_0 = arith.constant 0 : index
    %0 = vector.load %arg1[%c0, %c0_0] : memref<32x768xbf16, #tpu.memory_space<vmem>>, vector<32x768xbf16>
    %c0_1 = arith.constant 0 : index
    %c0_2 = arith.constant 0 : index
    %1 = vector.load %arg2[%c0_1, %c0_2] : memref<768x128xbf16, #tpu.memory_space<vmem>>, vector<768x128xbf16>
    %cst = arith.constant dense<0.000000e+00> : vector<32x128xf32>
    %2 = tpu.matmul %0, %1, %cst {dimension_numbers = #tpu.dot_dimension_numbers<[1], [0], [0], [1], [0, 0, 1, 1], [], []>} : vector<32x768xbf16>, vector<768x128xbf16>, vector<32x128xf32> -> vector<32x128xf32>
    %c0_3 = arith.constant 0 : index
    %c0_4 = arith.constant 0 : index
    %3 = vector.load %arg3[%c0_3, %c0_4] : memref<1x128xf32, #tpu.memory_space<vmem>>, vector<1x128xf32>
    %4 = vector.broadcast %3 : vector<1x128xf32> to vector<32x128xf32>
    %5 = arith.addf %2, %4 : vector<32x128xf32>
    %c0_5 = arith.constant 0 : index
    %c0_6 = arith.constant 0 : index
    %6 = vector.load %arg4[%c0_5, %c0_6] : memref<32x128xf32, #tpu.memory_space<vmem>>, vector<32x128xf32>
    tpu.vector_store %arg4[%c0_5, %c0_6], %5 {strides = array<i32>} : memref<32x128xf32, #tpu.memory_space<vmem>>, vector<32x128xf32>,
    return
  }
  func.func @transform_0(%arg0: i32) -> (i32, i32) {
    %c0_i32 = arith.constant 0 : i32
    %c0_i32_0 = arith.constant 0 : i32
    return %arg0, %c0_i32 : i32, i32
  }
  func.func @transform_1(%arg0: i32) -> (i32, i32) {
    %c0_i32 = arith.constant 0 : i32
    %c0_i32_0 = arith.constant 0 : i32
    %c0_i32_1 = arith.constant 0 : i32
    return %c0_i32, %c0_i32_0 : i32, i32
  }
  func.func @transform_2(%arg0: i32) -> (i32, i32) {
    %c0_i32 = arith.constant 0 : i32
    %c0_i32_0 = arith.constant 0 : i32
    %c0_i32_1 = arith.constant 0 : i32
    return %c0_i32, %c0_i32_0 : i32, i32
  }
  func.func @transform_3(%arg0: i32) -> (i32, i32) {
    %c0_i32 = arith.constant 0 : i32
    %c0_i32_0 = arith.constant 0 : i32
    return %arg0, %c0_i32 : i32, i32
  }
}

</mosaic_0001>

<bundles_post_ra>
// kernel: patch_embed_forward.1
= control target key start
LH: loop header
LB: loop body
LE: loop exit
PB: predicated region body
PF: predicated region fallthrough
CT: control target
= control target key end

     0   :  { %s1118_s0 = inlined_call_operand.vmem [shape: bf16[32,768], index: 0, kind: input, shape index: {}]   ;;  %s1119_s1 = inlined_call_operand.vmem [shape: bf16[768,128], index: 1, kind: input, shape index: {}]   ;;  %s1120_s2 = inlined_call_operand.vmem [shape: f32[1,128], index: 2, kind: input, shape index: {}]   ;;  %s1121_s3 = inlined_call_operand.hbm [shape: f32[32,128], index: 3, kind: output, shape index: {}]  }
   0x1   :  { %v810_v0 = vld [vmem:[%s1119_s1 + $0x40] sm:$0xff]   ;;  %v814_v4 = vld [vmem:[%s1119_s1 + $0x48] sm:$0xff]   ;;  %v818_v8 = vld [vmem:[%s1119_s1 + $0x50] sm:$0xff]  }
   0x2   :  { %v811_v1 = vld [vmem:[%s1119_s1 + $0xc0] sm:$0xff]   ;;  %707 = vmatprep.subr.bf16.mxu0 %v810_v0  ;;  %v815_v5 = vld [vmem:[%s1119_s1 + $0xc8] sm:$0xff]   ;;  %v819_v9 = vld [vmem:[%s1119_s1 + $0xd0] sm:$0xff]  }
   0x3   :  { %v812_v2 = vld [vmem:[%s1119_s1] sm:$0xff]   ;;  %735 = vmatprep.subr.bf16.mxu1 %v811_v1  ;;  %v816_v6 = vld [vmem:[%s1119_s1 + $0x8] sm:$0xff]   ;;  %v820_v10 = vld [vmem:[%s1119_s1 + $0x10] sm:$0xff]  }
   0x4   :  { %v813_v3 = vld [vmem:[%s1119_s1 + $0x80] sm:$0xff]   ;;  %708 = vmatpush3.bf16.msra.mxu0 %v812_v2  ;;  %v817_v7 = vld [vmem:[%s1119_s1 + $0x88] sm:$0xff]   ;;  %v821_v11 = vld [vmem:[%s1119_s1 + $0x90] sm:$0xff]  }
   0x5   :  { %736 = vmatpush3.bf16.msra.mxu1 %v813_v3  ;;  %709 = vmatprep.subr.bf16.mxu0 %v814_v4  ;;  %v822_v12 = vld [vmem:[%s1119_s1 + $0x58] sm:$0xff]   ;;  %v826_v16 = vld [vmem:[%s1119_s1 + $0x60] sm:$0xff]   ;;  %v830_v20 = vld [vmem:[%s1119_s1 + $0x68] sm:$0xff]  }
   0x6   :  { %737 = vmatprep.subr.bf16.mxu1 %v815_v5  ;;  %v823_v13 = vld [vmem:[%s1119_s1 + $0xd8] sm:$0xff]   ;;  %v827_v17 = vld [vmem:[%s1119_s1 + $0xe0] sm:$0xff]   ;;  %v831_v21 = vld [vmem:[%s1119_s1 + $0xe8] sm:$0xff]  }
   0x7   :  { %v824_v14 = vld [vmem:[%s1119_s1 + $0x18] sm:$0xff]   ;;  %v828_v18 = vld [vmem:[%s1119_s1 + $0x20] sm:$0xff]   ;;  %v832_v22 = vld [vmem:[%s1119_s1 + $0x28] sm:$0xff]  }
   0x8   :  { %710 = vmatpush3.bf16.msra.mxu0 %v816_v6  ;;  %v825_v15 = vld [vmem:[%s1119_s1 + $0x98] sm:$0xff]   ;;  %v829_v19 = vld [vmem:[%s1119_s1 + $0xa0] sm:$0xff]   ;;  %v833_v23 = vld [vmem:[%s1119_s1 + $0xa8] sm:$0xff]  }
   0x9   :  { %738 = vmatpush3.bf16.msra.mxu1 %v817_v7  ;;  %711 = vmatprep.subr.bf16.mxu0 %v818_v8  ;;  %v834_v24 = vld [vmem:[%s1119_s1 + $0x70] sm:$0xff]   ;;  %v838_v28 = vld [vmem:[%s1119_s1 + $0x78] sm:$0xff]   ;;  %v845_v34 = vld [vmem:[%s1118_s0 + $0x8] ss:$24 sps:$4 sm:$0xff]  }
   0xa   :  { %739 = vmatprep.subr.bf16.mxu1 %v819_v9  ;;  %v835_v25 = vld [vmem:[%s1119_s1 + $0xf0] sm:$0xff]   ;;  %v839_v29 = vld [vmem:[%s1119_s1 + $0xf8] sm:$0xff]   ;;  %v847_v35 = vld [vmem:[%s1118_s0 + $0xc] ss:$24 sps:$4 sm:$0xff]  }
   0xb   :  { %v836_v26 = vld [vmem:[%s1119_s1 + $0x30] sm:$0xff]   ;;  %v840_v30 = vld [vmem:[%s1119_s1 + $0x38] sm:$0xff]   ;;  %v848_v36 = vld [vmem:[%s1119_s1 + $0x140] sm:$0xff]   ;;  %560 = vmatprep.mubr.bf16.mxu1 %v847_v35 }
   0xc   :  { %712 = vmatpush3.bf16.msra.mxu0 %v820_v10  ;;  %v837_v27 = vld [vmem:[%s1119_s1 + $0xb0] sm:$0xff]   ;;  %v841_v31 = vld [vmem:[%s1119_s1 + $0xb8] sm:$0xff]   ;;  %v849_v37 = vld [vmem:[%s1119_s1 + $0x100] sm:$0xff]  }
   0xd   :  { %740 = vmatpush3.bf16.msra.mxu1 %v821_v11  ;;  %713 = vmatprep.subr.bf16.mxu0 %v822_v12  ;;  %v842_v32 = vld [vmem:[%s1118_s0] ss:$24 sps:$4 sm:$0xff]   ;;  %v844_v33 = vld [vmem:[%s1118_s0 + $0x4] ss:$24 sps:$4 sm:$0xff]   ;;  %v850_v38 = vld [vmem:[%s1119_s1 + $0x148] sm:$0xff]  }
   0xe   :  { %741 = vmatprep.subr.bf16.mxu1 %v823_v13  ;;  %511 = vmatprep.mubr.bf16.mxu0 %v844_v33  ;;  %v851_v39 = vld [vmem:[%s1119_s1 + $0x108] sm:$0xff]   ;;  %v852_v40 = vld [vmem:[%s1119_s1 + $0x150] sm:$0xff]   ;;  %v854_v42 = vld [vmem:[%s1119_s1 + $0x158] sm:$0xff]  }
   0xf   :  { %v853_v41 = vld [vmem:[%s1119_s1 + $0x110] sm:$0xff]   ;;  %v855_v43 = vld [vmem:[%s1119_s1 + $0x118] sm:$0xff]   ;;  %v856_v47 = vld [vmem:[%s1119_s1 + $0x160] sm:$0xff]  }
  0x10   :  { %714 = vmatpush3.bf16.msra.mxu0 %v824_v14  ;;  %v858_v44 = vld [vmem:[%s1118_s0 + $0x34] ss:$24 sps:$4 sm:$0xff]   ;;  %v860_v45 = vld [vmem:[%s1118_s0 + $0x30] ss:$24 sps:$4 sm:$0xff]   ;;  %v857_v49 = vld [vmem:[%s1119_s1 + $0x120] sm:$0xff]  }
  0x11   :  { %742 = vmatpush3.bf16.msra.mxu1 %v825_v15  ;;  %715 = vmatprep.subr.bf16.mxu0 %v826_v16  ;;  %v861_v46 = vld [vmem:[%s1118_s0 + $0x3c] ss:$24 sps:$4 sm:$0xff]   ;;  %v864_v48 = vld [vmem:[%s1118_s0 + $0x38] ss:$24 sps:$4 sm:$0xff]   ;;  %v863_v50 = vld [vmem:[%s1119_s1 + $0x168] sm:$0xff]  }
  0x12   :  { %743 = vmatprep.subr.bf16.mxu1 %v827_v17  ;;  %v865_v51 = vld [vmem:[%s1119_s1 + $0x128] sm:$0xff]   ;;  %v866_v53 = vld [vmem:[%s1119_s1 + $0x170] sm:$0xff]   ;;  %v875_v54 = vld [vmem:[%s1118_s0 + $0x44] ss:$24 sps:$4 sm:$0xff]  }
  0x13   :  { %v872_v52 = vld [vmem:[%s1118_s0 + $0x14] ss:$24 sps:$4 sm:$0xff]  }
  0x14   :  { %716 = vmatpush3.bf16.msra.mxu0 %v828_v18 }
  0x15   :  { %744 = vmatpush3.bf16.msra.mxu1 %v829_v19  ;;  %717 = vmatprep.subr.bf16.mxu0 %v830_v20 }
  0x16   :  { %745 = vmatprep.subr.bf16.mxu1 %v831_v21 }
  0x18   :  { %718 = vmatpush3.bf16.msra.mxu0 %v832_v22 }
  0x19   :  { %746 = vmatpush3.bf16.msra.mxu1 %v833_v23  ;;  %719 = vmatprep.subr.bf16.mxu0 %v834_v24 }
  0x1a   :  { %747 = vmatprep.subr.bf16.mxu1 %v835_v25 }
  0x1c   :  { %720 = vmatpush3.bf16.msra.mxu0 %v836_v26 }
  0x1d   :  { %748 = vmatpush3.bf16.msra.mxu1 %v837_v27  ;;  %721 = vmatprep.subr.bf16.mxu0 %v838_v28 }
  0x1e   :  { %749 = vmatprep.subr.bf16.mxu1 %v839_v29 }
  0x20   :  { %722 = vmatpush3.bf16.msra.mxu0 %v840_v30 }
  0x21   :  { %750 = vmatpush3.bf16.msra.mxu1 %v841_v31  ;;  %763 = vmatprep.subr.bf16.mxu0 %v848_v36 }
  0x22   :  { %791 = vmatprep.subr.bf16.mxu1 %v848_v36 }
  0x23   :  { %512 = vmatmul.mubr.bf16.vlgmr.msra.gmra.mrb[0].mxu0 %v842_v32 }
  0x24   :  { %561 = vmatmul.mubr.bf16.vlgmr.msra.gmra.mrb[0].mxu1 %v845_v34  ;;  %764 = vmatpush3.bf16.msra.mxu0 %v849_v37 }
  0x25   :  { %799 = vmatpush3.bf16.msra.mxu1 %v849_v37  ;;  %765 = vmatprep.subr.bf16.mxu0 %v850_v38 }
  0x26   :  { %792 = vmatprep.subr.bf16.mxu1 %v850_v38  ;;  %519 = vmatprep.mubr.bf16.mxu0 %v858_v44 }
  0x27   :  { %568 = vmatprep.mubr.bf16.mxu1 %v861_v46 }
  0x28   :  { %766 = vmatpush3.bf16.msra.mxu0 %v851_v39 }
  0x29   :  { %800 = vmatpush3.bf16.msra.mxu1 %v851_v39  ;;  %767 = vmatprep.subr.bf16.mxu0 %v852_v40 }
  0x2a   :  { %793 = vmatprep.subr.bf16.mxu1 %v852_v40 }
  0x2b   :  { %520 = vmatmul.mubr.bf16.gmra.mrb[4].mxu0 %v860_v45 }
  0x2c   :  { %768 = vmatpush3.bf16.msra.mxu0 %v853_v41  ;;  %569 = vmatmul.mubr.bf16.gmra.mrb[4].mxu1 %v864_v48 }
  0x2d   :  { %801 = vmatpush3.bf16.msra.mxu1 %v853_v41  ;;  %769 = vmatprep.subr.bf16.mxu0 %v854_v42 }
  0x2e   :  { %794 = vmatprep.subr.bf16.mxu1 %v854_v42  ;;  %609 = vmatprep.mubr.bf16.mxu0 %v872_v52 }
  0x30   :  { %770 = vmatpush3.bf16.msra.mxu0 %v855_v43 }
  0x31   :  { %802 = vmatpush3.bf16.msra.mxu1 %v855_v43  ;;  %771 = vmatprep.subr.bf16.mxu0 %v856_v47 }
  0x32   :  { %795 = vmatprep.subr.bf16.mxu1 %v856_v47 }
  0x34   :  { %772 = vmatpush3.bf16.msra.mxu0 %v857_v49 }
  0x35   :  { %803 = vmatpush3.bf16.msra.mxu1 %v857_v49  ;;  %773 = vmatprep.subr.bf16.mxu0 %v863_v50 }
  0x36   :  { %796 = vmatprep.subr.bf16.mxu1 %v863_v50 }
  0x37   :  { %8 = vsyncpa [#allocation3], 0  ;;  %617 = vmatprep.mubr.bf16.mxu1 %v875_v54  ;;  %v867_v55 = vld [vmem:[%s1119_s1 + $0x130] sm:$0xff]   ;;  %v868_v56 = vld [vmem:[%s1119_s1 + $0x178] sm:$0xff]  }
  0x38   :  { %774 = vmatpush3.bf16.msra.mxu0 %v865_v51  ;;  %v869_v57 = vld [vmem:[%s1119_s1 + $0x138] sm:$0xff]   ;;  %v870_v58 = vld [vmem:[%s1118_s0 + $0x10] ss:$24 sps:$4 sm:$0xff]   ;;  %v646_v62 = vld [vmem:[%s1120_s2] ss:$0 sm:$0xff] }
  0x39   :  { %804 = vmatpush3.bf16.msra.mxu1 %v865_v51  ;;  %775 = vmatprep.subr.bf16.mxu0 %v866_v53  ;;  %v873_v59 = vld [vmem:[%s1118_s0 + $0x40] ss:$24 sps:$4 sm:$0xff]   ;;  %s900_s0 = smov [#allocation2]  }
  0x3a   :  { %797 = vmatprep.subr.bf16.mxu1 %v866_v53  ;;  %s635_s1 = sshll.u32 %s900_s0, 4  ;;  %s636_s1 = int_to_ptr.vmem [resolvable:$true] %s635_s1 }
  0x3b   :  { %s876_s2 = scalar_lea.vmem %s636_s1, 512  ;;  %p881_p1 = scmp.lt.s32.totalorder %s636_s1, %s636_s1 }
  0x3c   :  { %776 = vmatpush3.bf16.msra.mxu0 %v867_v55  ;;  %p877_p0 = scmp.ne.s32.totalorder %s636_s1, %s876_s2  ;;  %p882_p2 = scmp.lt.s32.totalorder %s876_s2, %s876_s2 }
  0x3d   :  { %805 = vmatpush3.bf16.msra.mxu1 %v867_v55  ;;  %777 = vmatprep.subr.bf16.mxu0 %v868_v56 }
  0x3e   :  { %798 = vmatprep.subr.bf16.mxu1 %v868_v56  ;;  %p883_p3 = por %p882_p2, %p881_p1 }
  0x40   :  { %778 = vmatpush3.bf16.msra.mxu0 %v869_v57  ;;  %p884_p4 = pnand %p883_p3, %p877_p0 }
  0x41   :  { %806 = vmatpush3.bf16.msra.mxu1 %v869_v57 }
  0x43   :  { %610 = vmatmul.mubr.bf16.vlgmr.msra.gmra.mrb[8].mxu0 %v870_v58 }
  0x44   :  { %618 = vmatmul.mubr.bf16.vlgmr.msra.gmra.mrb[8].mxu1 %v873_v59 }
  0xf6   :  { %v723_v60 = vpop.f32.mrb[0].mxu0 }
  0xf7   :  { %v751_v61 = vpop.f32.mrb[0].mxu1  ;;  %v724_v63 = vpop.f32.mrb[1].mxu0 }
  0xf8   :  { %v725_v0 = vadd.f32 %v724_v63, %v723_v60  ;;  %v752_v1 = vpop.f32.mrb[1].mxu1  ;;  %v726_v2 = vpop.f32.mrb[2].mxu0 }
  0xf9   :  { %v753_v3 = vadd.f32 %v752_v1, %v751_v61  ;;  %v754_v4 = vpop.f32.mrb[2].mxu1  ;;  %v727_v5 = vpop.f32.mrb[3].mxu0 }
  0xfa   :  { %v514_v6 = vadd.f32 %v725_v0, %v646_v62  ;;  %v728_v7 = vadd.f32 %v727_v5, %v726_v2  ;;  %v755_v8 = vpop.f32.mrb[3].mxu1 }
  0xfb   :  { %v756_v9 = vadd.f32 %v755_v8, %v754_v4 }
  0xfc   :  { %v563_v10 = vadd.f32 %v753_v3, %v514_v6  ;;  %v517_v11 = vadd.f32 %v728_v7, %v646_v62 }
  0xfe   :  { %v566_v12 = vadd.f32 %v756_v9, %v517_v11  ;;  %v729_v13 = vpop.f32.mrb[4].mxu0 }
  0xff   :  { %v730_v14 = vpop.f32.mrb[5].mxu0  ;;  %v757_v15 = vpop.f32.mrb[4].mxu1 }
 0x100   :  { %v731_v16 = vadd.f32 %v730_v14, %v729_v13  ;;  %v732_v17 = vpop.f32.mrb[6].mxu0  ;;  %v758_v18 = vpop.f32.mrb[5].mxu1 }
 0x101   :  { %v733_v19 = vpop.f32.mrb[7].mxu0  ;;  %v759_v20 = vadd.f32 %v758_v18, %v757_v15  ;;  %v760_v21 = vpop.f32.mrb[6].mxu1 }
 0x102   :  { %v522_v22 = vadd.f32 %v731_v16, %v646_v62  ;;  %v734_v23 = vadd.f32 %v733_v19, %v732_v17  ;;  %v761_v24 = vpop.f32.mrb[7].mxu1 }
 0x103   :  { %v762_v25 = vadd.f32 %v761_v24, %v760_v21 }
 0x104   :  { %v525_v26 = vadd.f32 %v734_v23, %v646_v62  ;;  %v571_v27 = vadd.f32 %v759_v20, %v522_v22 }
 0x106   :  { %v574_v28 = vadd.f32 %v762_v25, %v525_v26 }
 0x116   :  { %v779_v29 = vpop.f32.mrb[8].mxu0 }
 0x117   :  { %v785_v30 = vpop.f32.mrb[8].mxu1  ;;  %v780_v31 = vpop.f32.mrb[9].mxu0 }
 0x118   :  { %v781_v32 = vadd.f32 %v780_v31, %v779_v29  ;;  %v786_v33 = vpop.f32.mrb[9].mxu1  ;;  %v782_v34 = vpop.f32.mrb[10].mxu0 }
 0x119   :  { %v787_v35 = vadd.f32 %v786_v33, %v785_v30  ;;  %v788_v36 = vpop.f32.mrb[10].mxu1  ;;  %v783_v37 = vpop.f32.mrb[11].mxu0 }
 0x11a   :  { %v612_v38 = vadd.f32 %v781_v32, %v563_v10  ;;  %v784_v39 = vadd.f32 %v783_v37, %v782_v34  ;;  %v789_v40 = vpop.f32.mrb[11].mxu1 }
 0x11b   :  { %v620_v41 = vadd.f32 %v787_v35, %v571_v27  ;;  %v790_v42 = vadd.f32 %v789_v40, %v788_v36 }
 0x11c   :  { %626 = vst [vmem:[#allocation2] sm:$0xff] %v612_v38  ;;  %v615_v43 = vadd.f32 %v784_v39, %v566_v12 }
 0x11d   :  { %628 = vst [vmem:[#allocation2 + $0x10] sm:$0xff] %v620_v41  ;;  %v623_v44 = vadd.f32 %v790_v42, %v574_v28 }
 0x11e   :  { %627 = vst [vmem:[#allocation2 + $0x8] sm:$0xff] %v615_v43 }
 0x11f   :  { %629 = vst [vmem:[#allocation2 + $0x18] sm:$0xff] %v623_v44 }
 0x120   :  { %887 = shalt.err (!%p884_p4)
}
 0x121   :  { %s888_s28 = scalar_lea.hbm %s1121_s3, 512 }
 0x122   :  { %p889_p5 = scmp.ne.s32.totalorder %s1121_s3, %s888_s28  ;;  %p892_p6 = scmp.lt.u32.totalorder %s888_s28, %s1121_s3 }
 0x124   :  { %p894_p7 = pnand %p892_p6, %p889_p5 }
 0x126   :  { %897 = shalt.err (!%p894_p7)
}
 0x127   :  { %s901_s6 = smov 128   ;;  %s902_s7 = smov 8  }
 0x128   :  { %641 = dma.vmem_to_hbm [thread:$0]  %s636_s1, 512, %s1121_s3, [#allocation3], %s901_s6, %s901_s6, %s902_s7  }
 0x129   :  { %898 = dma.done.wait [#allocation3], 512  }
 0x12a   :  { %899 = vsyncadd [#allocation3], 4294966784 }
 0x12b   :  { %645 = vsyncpa [#allocation3], 1 }

</bundles_post_ra>
